<compile_context>
chip_gen: v6e
topology: v6e:2x2x1
jax: 0.10.0
libtpu: 0.0.40
codegen_flags: <defaults>
</compile_context>

<pallas_src>
import jax
import jax.numpy as jnp
from jax import lax
from jax.experimental import pallas as pl
from jax.experimental.pallas import tpu as pltpu


def _round_up(x, m):
    return ((x + m - 1) // m) * m


def _make_decoder_kernel(T, B, V, H):
    """Kernel factory: T GRU decode steps run inside ONE kernel invocation."""
    unroll = bool(T <= 8)   # short fixed loops: give the scheduler visibility

    def kernel(ids_ref, h0_ref, wtop_ref, wbot_ref, wout_ref, bout_ref,
               logp_ref, hout_ref):
        # Resident weights: loaded once, reused by every step of the loop.
        w_top = wtop_ref[...]      # (V, 4H)  [G_r+b_hh_r | G_z+b_hh_z | G_n | b_hh_n]
        w_bot = wbot_ref[...]      # (H, 4H)  [W_hr^T | W_hz^T | 0 | W_hn^T]
        w_out = wout_ref[...]      # (H, Opad)
        b_out = bout_ref[...]      # (1, Opad)  (-1e30 on padded lanes)
        lane_iota = lax.broadcasted_iota(jnp.int32, (B, V), 1)   # hoisted once

        def step(t, h):
            # One-hot token row.  Ids are assumed in [0, V); an OOB id yields an
            # all-zero row (silently drops input gate + folded b_hh) -- caller
            # must guarantee valid ids.
            ids_t = ids_ref[t]                                   # (B, 1) int32
            onehot = (lane_iota == ids_t).astype(jnp.float32)    # (B, V)

            # fused = [r_pre | z_pre | gi_n | gh_n]; both GRU biases folded in
            # (one-hot rows sum to exactly 1.0 in f32).
            fused = (jnp.dot(onehot, w_top, preferred_element_type=jnp.float32)
                     + jnp.dot(h, w_bot, preferred_element_type=jnp.float32))

            # PyTorch GRU gate order [r, z, n]; transcendentals on the EUP.
            r = jax.nn.sigmoid(fused[:, 0:H])
            z = jax.nn.sigmoid(fused[:, H:2 * H])
            n = jnp.tanh(fused[:, 2 * H:3 * H] + r * fused[:, 3 * H:4 * H])
            h_new = (1.0 - z) * n + z * h                        # (B, H)

            # Linear -> LogSoftmax over a lane-dense (128-wide) padded vocab.
            # Padded lanes have -1e30 bias: never the max, exp underflows to 0.
            logits = jnp.dot(h_new, w_out,
                             preferred_element_type=jnp.float32) + b_out
            m = jnp.max(logits, axis=-1, keepdims=True)
            s = logits - m
            lse = jnp.log(jnp.sum(jnp.exp(s), axis=-1, keepdims=True))
            logp_ref[t] = s - lse                                # (B, Opad) store
            return h_new

        h_final = lax.fori_loop(0, T, step, h0_ref[...], unroll=unroll)
        hout_ref[...] = h_final        # hidden state written once, after the loop

    return kernel


class DecoderRNNPallas:
    """JAX/Pallas port of the PyTorch DecoderRNN forward pass."""

    def __init__(self, input_size, em_size, hidden_size, output_size, key):
        self.input_size = input_size
        self.em_size = em_size
        self.hidden_size = hidden_size
        self.output_size = output_size
        self.opad = max(128, _round_up(output_size, 128))

        V, E, H, O = input_size, em_size, hidden_size, output_size
        ks = jax.random.split(key, 7)
        bound = 1.0 / (hidden_size ** 0.5)

        # --- PyTorch-equivalent parameters (also used by the pure-JAX ref) ---
        # nn.Embedding(V, E): N(0, 1); nn.GRU / nn.Linear: U(-1/sqrt(H), 1/sqrt(H)).
        # Weight matrices stored transposed, i.e. (in_features, out_features).
        self.embedding = jax.random.normal(ks[0], (V, E), jnp.float32)
        self.w_ih_t = jax.random.uniform(ks[1], (E, 3 * H), jnp.float32, -bound, bound)
        self.w_hh_t = jax.random.uniform(ks[2], (H, 3 * H), jnp.float32, -bound, bound)
        self.b_ih = jax.random.uniform(ks[3], (1, 3 * H), jnp.float32, -bound, bound)
        self.b_hh = jax.random.uniform(ks[4], (1, 3 * H), jnp.float32, -bound, bound)
        self.w_out_t = jax.random.uniform(ks[5], (H, O), jnp.float32, -bound, bound)
        self.b_out = jax.random.uniform(ks[6], (1, O), jnp.float32, -bound, bound)

        # --- Kernel-side fused / precomputed parameters ---
        # G[v] = relu(embedding[v]) @ W_ih^T + b_ih  (ReLU commutes with the row
        # gather; removes the ReLU + input GEMM from the per-step kernel).
        g = jnp.maximum(self.embedding, 0.0) @ self.w_ih_t + self.b_ih          # (V, 3H)
        b_hh_r = self.b_hh[:, 0:H]
        b_hh_z = self.b_hh[:, H:2 * H]
        b_hh_n = self.b_hh[:, 2 * H:3 * H]
        # 4H-column block weights so that  onehot @ w_top + h @ w_bot
        #   == [gi_r+gh_r | gi_z+gh_z | gi_n | gh_n]  with both biases folded.
        self.w_top = jnp.concatenate(
            [g[:, 0:H] + b_hh_r,
             g[:, H:2 * H] + b_hh_z,
             g[:, 2 * H:3 * H],
             jnp.tile(b_hh_n, (V, 1))], axis=1)                                 # (V, 4H)
        self.w_bot = jnp.concatenate(
            [self.w_hh_t[:, 0:H],
             self.w_hh_t[:, H:2 * H],
             jnp.zeros((H, H), jnp.float32),
             self.w_hh_t[:, 2 * H:3 * H]], axis=1)                              # (H, 4H)
        # Lane-dense output projection (pad to multiple of 128); padded lanes
        # get a -1e30 bias so log-softmax ignores them.  Keep f32 (the -1e30
        # trick saturates in bf16).
        self.w_out_pad = jnp.zeros((H, self.opad), jnp.float32).at[:, :O].set(self.w_out_t)
        self.b_out_pad = jnp.full((1, self.opad), -1e30, jnp.float32).at[:, :O].set(self.b_out)

    def init_hidden(self, batch=1):
        return jnp.zeros((1, batch, self.hidden_size), jnp.float32)

    def _decode(self, ids, h0):
        """Run T fused GRU decode steps in ONE kernel. ids: (T, B) int; h0: (B, H)."""
        T, B = ids.shape
        H, V, Opad = self.hidden_size, self.input_size, self.opad
        ids3 = ids.reshape(T, B, 1).astype(jnp.int32)

        kernel = _make_decoder_kernel(T, B, V, H)

        flops_step = 2 * B * (V + H) * (4 * H) + 2 * B * H * Opad + 12 * B * H
        trans_step = B * (3 * H + Opad + 1)
        cost = pl.CostEstimate(
            flops=T * flops_step,
            transcendentals=T * trans_step,
            bytes_accessed=4 * (self.w_top.size + self.w_bot.size
                                + self.w_out_pad.size + self.b_out_pad.size
                                + 2 * B * H + T * B * (1 + Opad)),
        )

        logp_pad, h_new = pl.pallas_call(
            kernel,
            grid=(1,),
            in_specs=[
                pl.BlockSpec((T, B, 1), lambda i: (0, 0, 0)),     # token ids (resident)
                pl.BlockSpec((B, H), lambda i: (0, 0)),           # initial hidden
                pl.BlockSpec((V, 4 * H), lambda i: (0, 0)),       # fused gate weight, top
                pl.BlockSpec((H, 4 * H), lambda i: (0, 0)),       # fused gate weight, bottom
                pl.BlockSpec((H, Opad), lambda i: (0, 0)),        # out projection
                pl.BlockSpec((1, Opad), lambda i: (0, 0)),        # out bias (padded -1e30)
            ],
            out_specs=(
                pl.BlockSpec((T, B, Opad), lambda i: (0, 0, 0)),  # per-step log-probs
                pl.BlockSpec((B, H), lambda i: (0, 0)),           # final hidden
            ),
            out_shape=(
                jax.ShapeDtypeStruct((T, B, Opad), jnp.float32),
                jax.ShapeDtypeStruct((B, H), jnp.float32),
            ),
            compiler_params=pltpu.CompilerParams(
                dimension_semantics=("arbitrary",)),
            cost_estimate=cost,
        )(ids3, h0, self.w_top, self.w_bot, self.w_out_pad, self.b_out_pad)

        return logp_pad[:, :, :self.output_size], h_new

    def forward(self, token_ids, hidden):
        """Exactly the PyTorch DecoderRNN.forward semantics (one GRU step)."""
        ids = token_ids.reshape(1, -1)                 # .view(1, -1, em): seq=1, batch=#tokens
        h0 = hidden[0]                                 # (B, H)
        logp, h_new = self._decode(ids, h0)            # logp: (1, B, O)
        # PyTorch: output = logsoftmax(out(gru_out[0])) -> (B, O); then it
        # returns output[0] (row 0 only, shape (O,)) together with hidden.
        return logp[0, 0], h_new[None, :, :]

    def forward_seq(self, token_seq, hidden):
        """Fused multi-step decode: T GRU steps in ONE pallas_call (in-kernel loop)."""
        logp, h_new = self._decode(token_seq.astype(jnp.int32), hidden[0])
        return logp, h_new[None, :, :]


def _reference_step(model, token_ids, h):
    """Pure-JAX (XLA) reference for one DecoderRNN step (validation)."""
    H = model.hidden_size
    x = jnp.maximum(jnp.take(model.embedding,
                             token_ids.reshape(-1).astype(jnp.int32), axis=0), 0.0)
    gi = x @ model.w_ih_t + model.b_ih
    gh = h @ model.w_hh_t + model.b_hh
    r = jax.nn.sigmoid(gi[:, 0:H] + gh[:, 0:H])
    z = jax.nn.sigmoid(gi[:, H:2 * H] + gh[:, H:2 * H])
    n = jnp.tanh(gi[:, 2 * H:3 * H] + r * gh[:, 2 * H:3 * H])
    h_new = (1.0 - z) * n + z * h
    logits = h_new @ model.w_out_t + model.b_out
    return jax.nn.log_softmax(logits, axis=-1), h_new


if __name__ == "__main__":
    key = jax.random.PRNGKey(0)
    k_param, k_ids, k_seq = jax.random.split(key, 3)

    input_size = 32    # vocab
    em_size = 32
    hidden_size = 32
    output_size = 16
    batch = 8          # tokens fed in one step (GRU seq_len is always 1)
    seq_len = 4        # steps for the fused multi-step decode demo

    model = DecoderRNNPallas(input_size, em_size, hidden_size, output_size, k_param)

    # --- single-step forward (matches the PyTorch module) ---
    token_ids = jax.random.randint(k_ids, (batch,), 0, input_size, jnp.int32)
    hidden = model.init_hidden(batch)
    logp_row0, new_hidden = model.forward(token_ids, hidden)
    jax.block_until_ready((logp_row0, new_hidden))
    assert logp_row0.shape == (output_size,)
    assert new_hidden.shape == (1, batch, hidden_size)

    ref_logp, ref_h = _reference_step(model, token_ids, hidden[0])
    assert bool(jnp.allclose(logp_row0, ref_logp[0], atol=1e-3, rtol=1e-3))
    assert bool(jnp.allclose(new_hidden[0], ref_h, atol=1e-3, rtol=1e-3))

    # --- fused multi-step decode: weights resident, T steps in one kernel ---
    token_seq = jax.random.randint(k_seq, (seq_len, batch), 0, input_size, jnp.int32)
    logp_seq, hidden_seq = model.forward_seq(token_seq, model.init_hidden(batch))
    jax.block_until_ready((logp_seq, hidden_seq))
    assert logp_seq.shape == (seq_len, batch, output_size)
    assert hidden_seq.shape == (1, batch, hidden_size)

    h_ref = model.init_hidden(batch)[0]
    for t in range(seq_len):
        lp_ref, h_ref = _reference_step(model, token_seq[t], h_ref)
        assert bool(jnp.allclose(logp_seq[t], lp_ref, atol=1e-3, rtol=1e-3))
    assert bool(jnp.allclose(hidden_seq[0], h_ref, atol=1e-3, rtol=1e-3))

    print("KERNEL_OK")
</pallas_src>

<mosaic_0001>
module attributes {stable_mosaic.version = 11 : i64} {
  func.func @kernel(%arg0: i32, %arg1: memref<1x8x1xi32, #tpu.memory_space<vmem>>, %arg2: memref<8x32xf32, #tpu.memory_space<vmem>>, %arg3: memref<32x128xf32, #tpu.memory_space<vmem>>, %arg4: memref<32x128xf32, #tpu.memory_space<vmem>>, %arg5: memref<32x128xf32, #tpu.memory_space<vmem>>, %arg6: memref<1x128xf32, #tpu.memory_space<vmem>>, %arg7: memref<1x8x128xf32, #tpu.memory_space<vmem>>, %arg8: memref<8x32xf32, #tpu.memory_space<vmem>>) attributes {dimension_semantics = [#tpu.dimension_semantics<arbitrary>], iteration_bounds = array<i64: 1>, scalar_prefetch = 0 : i64, scratch_operands = 0 : i64, tpu.core_type = #tpu.core_type<tc>, window_params = [{pipeline_mode = #tpu.pipeline_mode<synchronous>, transform_indices = @transform_0, window_bounds = array<i64: 1, 8, 1>}, {pipeline_mode = #tpu.pipeline_mode<synchronous>, transform_indices = @transform_1, window_bounds = array<i64: 8, 32>}, {pipeline_mode = #tpu.pipeline_mode<synchronous>, transform_indices = @transform_2, window_bounds = array<i64: 32, 128>}, {pipeline_mode = #tpu.pipeline_mode<synchronous>, transform_indices = @transform_3, window_bounds = array<i64: 32, 128>}, {pipeline_mode = #tpu.pipeline_mode<synchronous>, transform_indices = @transform_4, window_bounds = array<i64: 32, 128>}, {pipeline_mode = #tpu.pipeline_mode<synchronous>, transform_indices = @transform_5, window_bounds = array<i64: 1, 128>}, {pipeline_mode = #tpu.pipeline_mode<synchronous>, transform_indices = @transform_6, window_bounds = array<i64: 1, 8, 128>}, {pipeline_mode = #tpu.pipeline_mode<synchronous>, transform_indices = @transform_7, window_bounds = array<i64: 8, 32>}]} {
    %c0 = arith.constant 0 : index
    %c0_0 = arith.constant 0 : index
    %0 = vector.load %arg3[%c0, %c0_0] : memref<32x128xf32, #tpu.memory_space<vmem>>, vector<32x128xf32>
    %c0_1 = arith.constant 0 : index
    %c0_2 = arith.constant 0 : index
    %1 = vector.load %arg4[%c0_1, %c0_2] : memref<32x128xf32, #tpu.memory_space<vmem>>, vector<32x128xf32>
    %c0_3 = arith.constant 0 : index
    %c0_4 = arith.constant 0 : index
    %2 = vector.load %arg5[%c0_3, %c0_4] : memref<32x128xf32, #tpu.memory_space<vmem>>, vector<32x128xf32>
    %c0_5 = arith.constant 0 : index
    %c0_6 = arith.constant 0 : index
    %3 = vector.load %arg6[%c0_5, %c0_6] : memref<1x128xf32, #tpu.memory_space<vmem>>, vector<1x128xf32>
    %4 = tpu.iota {dimensions = array<i32: 1>} : vector<8x32xi32>
    %c0_7 = arith.constant 0 : index
    %c0_8 = arith.constant 0 : index
    %5 = vector.load %arg2[%c0_7, %c0_8] : memref<8x32xf32, #tpu.memory_space<vmem>>, vector<8x32xf32>
    %c0_i32 = arith.constant 0 : i32
    %6 = arith.index_cast %c0_i32 : i32 to index
    %c0_9 = arith.constant 0 : index
    %c0_10 = arith.constant 0 : index
    %7 = vector.load %arg1[%6, %c0_9, %c0_10] : memref<1x8x1xi32, #tpu.memory_space<vmem>>, vector<1x8x1xi32>
    %8 = vector.shape_cast %7 : vector<1x8x1xi32> to vector<8x1xi32>
    %9 = vector.broadcast %8 : vector<8x1xi32> to vector<8x32xi32>
    %10 = arith.cmpi eq, %4, %9 : vector<8x32xi32>
    %11 = arith.extui %10 : vector<8x32xi1> to vector<8x32xi32>
    %12 = arith.sitofp %11 : vector<8x32xi32> to vector<8x32xf32>
    %cst = arith.constant dense<0.000000e+00> : vector<8x128xf32>
    %13 = tpu.matmul %12, %0, %cst {dimension_numbers = #tpu.dot_dimension_numbers<[1], [0], [0], [1], [0, 0, 1, 1], [], []>} : vector<8x32xf32>, vector<32x128xf32>, vector<8x128xf32> -> vector<8x128xf32>
    %cst_11 = arith.constant dense<0.000000e+00> : vector<8x128xf32>
    %14 = tpu.matmul %5, %1, %cst_11 {dimension_numbers = #tpu.dot_dimension_numbers<[1], [0], [0], [1], [0, 0, 1, 1], [], []>} : vector<8x32xf32>, vector<32x128xf32>, vector<8x128xf32> -> vector<8x128xf32>
    %15 = arith.addf %13, %14 : vector<8x128xf32>
    %16 = vector.extract_strided_slice %15 {offsets = [0, 0], sizes = [8, 32], strides = [1, 1]} : vector<8x128xf32> to vector<8x32xf32>
    %17 = arith.negf %16 : vector<8x32xf32>
    %18 = math.exp %17 : vector<8x32xf32>
    %cst_12 = arith.constant 1.000000e+00 : f32
    %19 = vector.broadcast %cst_12 : f32 to vector<8x32xf32>
    %20 = arith.addf %19, %18 : vector<8x32xf32>
    %21 = arith.divf %19, %20 : vector<8x32xf32>
    %22 = vector.extract_strided_slice %15 {offsets = [0, 32], sizes = [8, 32], strides = [1, 1]} : vector<8x128xf32> to vector<8x32xf32>
    %23 = arith.negf %22 : vector<8x32xf32>
    %24 = math.exp %23 : vector<8x32xf32>
    %cst_13 = arith.constant 1.000000e+00 : f32
    %25 = vector.broadcast %cst_13 : f32 to vector<8x32xf32>
    %26 = arith.addf %25, %24 : vector<8x32xf32>
    %27 = arith.divf %25, %26 : vector<8x32xf32>
    %28 = vector.extract_strided_slice %15 {offsets = [0, 64], sizes = [8, 32], strides = [1, 1]} : vector<8x128xf32> to vector<8x32xf32>
    %29 = vector.extract_strided_slice %15 {offsets = [0, 96], sizes = [8, 32], strides = [1, 1]} : vector<8x128xf32> to vector<8x32xf32>
    %30 = arith.mulf %21, %29 : vector<8x32xf32>
    %31 = arith.addf %28, %30 : vector<8x32xf32>
    %32 = math.tanh %31 : vector<8x32xf32>
    %cst_14 = arith.constant 1.000000e+00 : f32
    %33 = vector.broadcast %cst_14 : f32 to vector<8x32xf32>
    %34 = arith.subf %33, %27 : vector<8x32xf32>
    %35 = arith.mulf %34, %32 : vector<8x32xf32>
    %36 = arith.mulf %27, %5 : vector<8x32xf32>
    %37 = arith.addf %35, %36 : vector<8x32xf32>
    %cst_15 = arith.constant dense<0.000000e+00> : vector<8x128xf32>
    %38 = tpu.matmul %37, %2, %cst_15 {dimension_numbers = #tpu.dot_dimension_numbers<[1], [0], [0], [1], [0, 0, 1, 1], [], []>} : vector<8x32xf32>, vector<32x128xf32>, vector<8x128xf32> -> vector<8x128xf32>
    %39 = vector.broadcast %3 : vector<1x128xf32> to vector<8x128xf32>
    %40 = arith.addf %38, %39 : vector<8x128xf32>
    %cst_16 = arith.constant dense<0xFF800000> : vector<8xf32>
    %41 = vector.multi_reduction <maximumf>, %40, %cst_16 [1] : vector<8x128xf32> to vector<8xf32>
    %42 = vector.shape_cast %41 : vector<8xf32> to vector<8x1xf32>
    %43 = vector.broadcast %42 : vector<8x1xf32> to vector<8x128xf32>
    %44 = arith.subf %40, %43 : vector<8x128xf32>
    %45 = math.exp %44 : vector<8x128xf32>
    %cst_17 = arith.constant dense<0.000000e+00> : vector<8xf32>
    %46 = vector.multi_reduction <add>, %45, %cst_17 [1] : vector<8x128xf32> to vector<8xf32>
    %47 = vector.shape_cast %46 : vector<8xf32> to vector<8x1xf32>
    %48 = math.log %47 : vector<8x1xf32>
    %49 = vector.broadcast %48 : vector<8x1xf32> to vector<8x128xf32>
    %50 = arith.subf %44, %49 : vector<8x128xf32>
    %51 = arith.index_cast %c0_i32 : i32 to index
    %c0_18 = arith.constant 0 : index
    %c0_19 = arith.constant 0 : index
    %52 = vector.load %arg7[%51, %c0_18, %c0_19] : memref<1x8x128xf32, #tpu.memory_space<vmem>>, vector<1x8x128xf32>
    %53 = vector.shape_cast %52 : vector<1x8x128xf32> to vector<8x128xf32>
    %54 = vector.shape_cast %50 : vector<8x128xf32> to vector<1x8x128xf32>
    tpu.vector_store %arg7[%51, %c0_18, %c0_19], %54 {strides = array<i32>} : memref<1x8x128xf32, #tpu.memory_space<vmem>>, vector<1x8x128xf32>,
    %c1_i32 = arith.constant 1 : i32
    %c0_20 = arith.constant 0 : index
    %c0_21 = arith.constant 0 : index
    %55 = vector.load %arg8[%c0_20, %c0_21] : memref<8x32xf32, #tpu.memory_space<vmem>>, vector<8x32xf32>
    tpu.vector_store %arg8[%c0_20, %c0_21], %37 {strides = array<i32>} : memref<8x32xf32, #tpu.memory_space<vmem>>, vector<8x32xf32>,
    return
  }
  func.func @transform_0(%arg0: i32) -> (i32, i32, i32) {
    %c0_i32 = arith.constant 0 : i32
    %c0_i32_0 = arith.constant 0 : i32
    %c0_i32_1 = arith.constant 0 : i32
    %c0_i32_2 = arith.constant 0 : i32
    return %c0_i32, %c0_i32_0, %c0_i32_1 : i32, i32, i32
  }
  func.func @transform_1(%arg0: i32) -> (i32, i32) {
    %c0_i32 = arith.constant 0 : i32
    %c0_i32_0 = arith.constant 0 : i32
    %c0_i32_1 = arith.constant 0 : i32
    return %c0_i32, %c0_i32_0 : i32, i32
  }
  func.func @transform_2(%arg0: i32) -> (i32, i32) {
    %c0_i32 = arith.constant 0 : i32
    %c0_i32_0 = arith.constant 0 : i32
    %c0_i32_1 = arith.constant 0 : i32
    return %c0_i32, %c0_i32_0 : i32, i32
  }
  func.func @transform_3(%arg0: i32) -> (i32, i32) {
    %c0_i32 = arith.constant 0 : i32
    %c0_i32_0 = arith.constant 0 : i32
    %c0_i32_1 = arith.constant 0 : i32
    return %c0_i32, %c0_i32_0 : i32, i32
  }
  func.func @transform_4(%arg0: i32) -> (i32, i32) {
    %c0_i32 = arith.constant 0 : i32
    %c0_i32_0 = arith.constant 0 : i32
    %c0_i32_1 = arith.constant 0 : i32
    return %c0_i32, %c0_i32_0 : i32, i32
  }
  func.func @transform_5(%arg0: i32) -> (i32, i32) {
    %c0_i32 = arith.constant 0 : i32
    %c0_i32_0 = arith.constant 0 : i32
    %c0_i32_1 = arith.constant 0 : i32
    return %c0_i32, %c0_i32_0 : i32, i32
  }
  func.func @transform_6(%arg0: i32) -> (i32, i32, i32) {
    %c0_i32 = arith.constant 0 : i32
    %c0_i32_0 = arith.constant 0 : i32
    %c0_i32_1 = arith.constant 0 : i32
    %c0_i32_2 = arith.constant 0 : i32
    return %c0_i32, %c0_i32_0, %c0_i32_1 : i32, i32, i32
  }
  func.func @transform_7(%arg0: i32) -> (i32, i32) {
    %c0_i32 = arith.constant 0 : i32
    %c0_i32_0 = arith.constant 0 : i32
    %c0_i32_1 = arith.constant 0 : i32
    return %c0_i32, %c0_i32_0 : i32, i32
  }
}

</mosaic_0001>

<bundles_post_ra>
// kernel: tpu_custom_call.1
= control target key start
LH: loop header
LB: loop body
LE: loop exit
PB: predicated region body
PF: predicated region fallthrough
CT: control target
= control target key end

     0   :  { %13 = vsyncpa [#allocation3], 0  ;;  %s676_s0 = inlined_call_operand.vmem [shape: s32[1,8,1], index: 0, kind: input, shape index: {}]   ;;  %s677_s1 = inlined_call_operand.vmem [shape: f32[8,32], index: 1, kind: input, shape index: {}]   ;;  %s678_s2 = inlined_call_operand.hbm [shape: f32[32,128], index: 2, kind: input, shape index: {}]   ;;  %s679_s3 = inlined_call_operand.hbm [shape: f32[32,128], index: 3, kind: input, shape index: {}]   ;;  %s680_s4 = inlined_call_operand.hbm [shape: f32[32,128], index: 4, kind: input, shape index: {}]   ;;  %s681_s5 = inlined_call_operand.vmem [shape: f32[1,128], index: 5, kind: input, shape index: {}]   ;;  %s682_s6 = inlined_call_operand.hbm [shape: f32[1,8,128], index: 6, kind: output, shape index: {0}]   ;;  %s683_s7 = inlined_call_operand.hbm [shape: f32[8,32], index: 7, kind: output, shape index: {1}]  }
   0x1   :  { %14 = vsyncpa [#allocation6], 0 }
   0x2   :  { %15 = vsyncpa [#allocation4], 0 }
   0x3   :  { %16 = vsyncpa [#allocation10], 0  ;;  %s576_s24 = smov [#allocation5]   ;;  %s577_s26 = smov [#allocation2]  }
   0x4   :  { %s38_s25 = sshll.u32 %s576_s24, 4  ;;  %s26_s27 = sshll.u32 %s577_s26, 4  ;;  %s39_s25 = int_to_ptr.vmem [resolvable:$true] %s38_s25  ;;  %s27_s27 = int_to_ptr.vmem [resolvable:$true] %s26_s27 }
   0x5   :  { %s476_s28 = scalar_lea.vmem %s39_s25, 512  ;;  %p481_p1 = scmp.lt.s32.totalorder %s39_s25, %s39_s25 }
   0x6   :  { %p477_p0 = scmp.ne.s32.totalorder %s39_s25, %s476_s28  ;;  %p482_p2 = scmp.lt.s32.totalorder %s476_s28, %s476_s28 }
   0x8   :  { %p483_p3 = por %p482_p2, %p481_p1 }
   0xa   :  { %p484_p4 = pnand %p483_p3, %p477_p0 }
   0xc   :  { %487 = shalt.err (!%p484_p4)
}
   0xd   :  { %s578_s29 = smov 128   ;;  %s579_s30 = smov 8  }
   0xe   :  { %44 = dma.hbm_to_vmem [thread:$0]  %s679_s3, 512, %s39_s25, [#allocation6], %s578_s29, %s578_s29, %s579_s30  }
   0xf   :  { %s496_s10 = scalar_lea.vmem %s27_s27, 512  ;;  %p501_p6 = scmp.lt.s32.totalorder %s27_s27, %s27_s27 }
  0x10   :  { %p497_p5 = scmp.ne.s32.totalorder %s27_s27, %s496_s10  ;;  %p502_p7 = scmp.lt.s32.totalorder %s496_s10, %s496_s10 }
  0x12   :  { %p503_p8 = por %p502_p7, %p501_p6 }
  0x14   :  { %p504_p9 = pnand %p503_p8, %p497_p5 }
  0x16   :  { %507 = shalt.err (!%p504_p9)
}
  0x17   :  { %32 = dma.hbm_to_vmem [thread:$0]  %s678_s2, 512, %s27_s27, [#allocation3], %s578_s29, %s578_s29, %s579_s30  }
  0x18   :  { %s580_s13 = smov [#allocation7]  }
  0x19   :  { %s50_s14 = sshll.u32 %s580_s13, 4  ;;  %s51_s14 = int_to_ptr.vmem [resolvable:$true] %s50_s14 }
  0x1a   :  { %s516_s15 = scalar_lea.vmem %s51_s14, 512  ;;  %p521_p11 = scmp.lt.s32.totalorder %s51_s14, %s51_s14 }
  0x1b   :  { %p517_p10 = scmp.ne.s32.totalorder %s51_s14, %s516_s15  ;;  %p522_p12 = scmp.lt.s32.totalorder %s516_s15, %s516_s15 }
  0x1d   :  { %p523_p13 = por %p522_p12, %p521_p11 }
  0x1f   :  { %p524_p0 = pnand %p523_p13, %p517_p10 }
  0x21   :  { %527 = shalt.err (!%p524_p0)
}
  0x22   :  { %56 = dma.hbm_to_vmem [thread:$0]  %s680_s4, 512, %s51_s14, [#allocation6], %s578_s29, %s578_s29, %s579_s30  }
  0x23   :  { %568 = dma.done.wait [#allocation3], 512  }
  0x24   :  { %569 = vsyncadd [#allocation3], 4294966784 }
  0x25   :  { %570 = dma.done.wait [#allocation6], 1024  }
  0x26   :  { %571 = vsyncadd [#allocation6], 4294966272  ;;  %v581_v0 = vmov 0   ;;  %v582_v1 = vmov 0.0   ;;  %vm583_vm0 = vmmov 0   ;;  %v84_v2 = vld [vmem:[%s676_s0] sm:$0xff]  ;;  %v81_v12 = vlaneseq }
  0x27   :  { %457 = vset.pattern.permute.xlu0 %v581_v0  ;;  %411 = vmatprep.subr.mxu0 %v582_v1  ;;  %v75_v3 = vld [vmem:[#allocation5 + $0x18] sm:$0xff]  ;;  %v74_v4 = vld [vmem:[#allocation5 + $0x10] sm:$0xff]  ;;  %v73_v7 = vld [vmem:[#allocation5 + $0x8] sm:$0xff]  ;;  %vm91_vm1 = vcmask 261120   ;;  %s585_s18 = smov 64   ;;  %s586_s19 = smov 96  }
  0x28   :  { %422 = vmatprep.subr.mxu1 %v582_v1  ;;  %419 = vmatprep.mubr.msk.f32.mxu0 %vm583_vm0, %v582_v1  ;;  %v71_v5 = vld [vmem:[#allocation2 + $0x18] sm:$0xff]  ;;  %v70_v6 = vld [vmem:[#allocation2 + $0x10] sm:$0xff]  ;;  %v69_v8 = vld [vmem:[#allocation2 + $0x8] sm:$0xff]  ;;  %v82_v13 = vand.u32 127, %v81_v12  ;;  %s587_s22 = smov [#allocation9]  }
  0x29   :  { %430 = vmatprep.mubr.msk.f32.mxu1 %vm583_vm0, %v582_v1  ;;  %86 = vperm.xlu0 %457, %v84_v2   ;;  %v72_v9 = vld [vmem:[#allocation5] sm:$0xff]  ;;  %v79_v29 = vld [vmem:[#allocation7 + $0x18] sm:$0xff]  ;;  %v78_v30 = vld [vmem:[#allocation7 + $0x10] sm:$0xff]  ;;  %s376_s23 = sshll.u32 %s587_s22, 4  ;;  %s377_s23 = int_to_ptr.vmem [resolvable:$true] %s376_s23 }
  0x2a   :  { %412 = vmatpush3.msra.mxu0 %v75_v3  ;;  %423 = vmatpush3.msra.mxu1 %v71_v5  ;;  %v83_v10 = vld [vmem:[%s677_s1] sm:$0xff]  ;;  %s584_s1 = smov 32   ;;  %v77_v31 = vld [vmem:[#allocation7 + $0x8] sm:$0xff]  ;;  %s528_s24 = scalar_lea.vmem %s377_s23, 128 }
  0x2b   :  { %413 = vmatprep.subr.mxu0 %v582_v1  ;;  %424 = vmatprep.subr.mxu1 %v582_v1  ;;  %v68_v11 = vld [vmem:[#allocation2] sm:$0xff]  ;;  %p529_p1 = scmp.ne.s32.totalorder %s377_s23, %s528_s24  ;;  %p533_p2 = scmp.lt.s32.totalorder %s377_s23, %s377_s23 }
  0x2c   :  { %414 = vmatpush3.msra.mxu0 %v74_v4  ;;  %425 = vmatpush3.msra.mxu1 %v70_v6  ;;  %v76_v32 = vld [vmem:[#allocation7] sm:$0xff]  ;;  %p534_p3 = scmp.lt.s32.totalorder %s528_s24, %s528_s24 }
  0x2d   :  { %415 = vmatprep.subr.mxu0 %v582_v1  ;;  %426 = vmatprep.subr.mxu1 %v582_v1  ;;  %v394_v41 = vld [vmem:[%s681_s5] ss:$0 sm:$0xff] }
  0x2e   :  { %416 = vmatpush3.msra.mxu0 %v73_v7  ;;  %427 = vmatpush3.msra.mxu1 %v69_v8  ;;  %p535_p4 = por %p534_p3, %p533_p2 }
  0x2f   :  { %417 = vmatprep.subr.mxu0 %v582_v1  ;;  %428 = vmatprep.subr.mxu1 %v582_v1 }
  0x30   :  { %418 = vmatpush3.msra.mxu0 %v72_v9  ;;  %429 = vmatpush3.msra.mxu1 %v68_v11  ;;  %p536_p5 = pnand %p535_p4, %p529_p1 }
  0x31   :  { %420 = vmatmul.mubr.msk.f32.vlgmr.msra.gmra.mxu0 %vm91_vm1, %v83_v10  ;;  %433 = vmatprep.subr.mxu0 %v582_v1 }
  0x32   :  { %441 = vmatprep.mubr.msk.f32.mxu0 %vm583_vm0, %v582_v1  ;;  %434 = vmatpush3.msra.mxu0 %v79_v29 }
  0x33   :  { %435 = vmatprep.subr.mxu0 %v582_v1 }
  0x34   :  { %436 = vmatpush3.msra.mxu0 %v78_v30 }
  0x35   :  { %437 = vmatprep.subr.mxu0 %v582_v1 }
  0x36   :  { %438 = vmatpush3.msra.mxu0 %v77_v31 }
  0x37   :  { %439 = vmatprep.subr.mxu0 %v582_v1 }
  0x38   :  { %440 = vmatpush3.msra.mxu0 %v76_v32 }
  0xa4   :  { %v87_v14 = vpop.permute.xlu0 %86 }
  0xa5   :  { %vm88_vm2 = vcmp.eq.s32.totalorder %v82_v13, %v87_v14 }
  0xa6   :  { %v390_v15 = vsel %vm88_vm2, 1.0, %v582_v1 }
  0xa7   :  { %431 = vmatmul.mubr.msk.f32.vlgmr.msra.gmra.mxu1 %vm91_vm1, %v390_v15 }
  0xf1   :  { %v161_v16 = vpop.f32.mrf.mxu0 }
  0xf3   :  { %v421_v17 = vpop.f32.mrf.mxu0 }
 0x167   :  { %v234_v18 = vpop.f32.mrf.mxu1 }
 0x168   :  { %v235_v19 = vadd.f32 %v234_v18, %v161_v16 }
 0x169   :  { %v432_v20 = vpop.f32.mrf.mxu1 }
 0x16a   :  { %245 = vrot.lane.b32.xlu0 %v235_v19, %s584_s1  ;;  %v393_v21 = vmul.f32 -1.442695, %v235_v19 }
 0x16c   :  { %458 = vpow2.f32 %v393_v21 }
 0x16e   :  { %261 = vrot.lane.b32.xlu0 %v83_v10, %s584_s1 }
 0x179   :  { %v459_v22 = vpop.eup %458 }
 0x17a   :  { %v241_v23 = vadd.f32 1.0, %v459_v22 }
 0x17c   :  { %460 = vrcp.f32 %v241_v23 }
 0x189   :  { %v461_v24 = vpop.eup %460 }
 0x18a   :  { %v255_v35 = vsub.f32 1.0, %v461_v24 }
 0x1dc   :  { %v246_v25 = vpop.permute.xlu0 %245 }
 0x1dd   :  { %v248_v26 = vmul.f32 %v461_v24, %v246_v25 }
 0x1df   :  { %250 = vrot.lane.b32.xlu1 %v248_v26, %s585_s18 }
 0x1e0   :  { %v262_v34 = vpop.permute.xlu0 %261 }
 0x1e1   :  { %v264_v37 = vmul.f32 %v461_v24, %v262_v34 }
 0x251   :  { %v251_v27 = vpop.permute.xlu1 %250 }
 0x252   :  { %v253_v28 = vadd.f32 %v251_v27, %v235_v19 }
 0x254   :  { %462 = vtanh.f32 %v253_v28 }
 0x261   :  { %v463_v33 = vpop.eup %462 }
 0x262   :  { %257 = vrot.lane.b32.xlu1 %v463_v33, %s586_s19 }
 0x2d4   :  { %v258_v36 = vpop.permute.xlu1 %257 }
 0x2d5   :  { %v260_v38 = vmul.f32 %v258_v36, %v255_v35 }
 0x2d7   :  { %v265_v39 = vadd.f32 %v264_v37, %v260_v38 }
 0x2d9   :  { %273 = vrot.lane.b32.xlu1 %v265_v39, %s586_s19 }
 0x34b   :  { %v274_v40 = vpop.permute.xlu1 %273 }
 0x34c   :  { %359 = vst.msk [vmem:[#allocation9] sm:$0xff] %vm91_vm1, %v274_v40  ;;  %442 = vmatmul.mubr.msk.f32.vlgmr.msra.gmra.mxu0 %vm91_vm1, %v274_v40 }
 0x40c   :  { %v343_v42 = vpop.f32.mrf.mxu0 }
 0x40d   :  { %v344_v43 = vadd.f32 %v394_v41, %v343_v42 }
 0x40e   :  { %v443_v44 = vpop.f32.mrf.mxu0 }
 0x40f   :  { %347 = vmax.xlane.f32.xlu0 %v344_v43 }
 0x498   :  { %v348_v45 = vpop.xlane.xlu0 %347 }
 0x499   :  { %v349_v46 = vsub.f32 %v344_v43, %v348_v45 }
 0x49b   :  { %v350_v47 = vmul.f32 1.442695, %v349_v46 }
 0x49d   :  { %464 = vpow2.f32 %v350_v47 }
 0x4aa   :  { %v465_v48 = vpop.eup %464 }
 0x4ab   :  { %352 = vadd.xlane.f32.xlu1 %v465_v48 }
 0x4ac   :  { %539 = shalt.err (!%p536_p5)
}
 0x4ad   :  { %379 = dma.vmem_to_hbm [thread:$0]  %s377_s23, 128, %s683_s7, [#allocation10]  }
 0x4ae   :  { %s588_s26 = smov [#allocation8]  }
 0x4af   :  { %s366_s27 = sshll.u32 %s588_s26, 4  ;;  %s367_s27 = int_to_ptr.vmem [resolvable:$true] %s366_s27 }
 0x4b0   :  { %s548_s28 = scalar_lea.vmem %s367_s27, 128  ;;  %p553_p7 = scmp.lt.s32.totalorder %s367_s27, %s367_s27 }
 0x4b1   :  { %p549_p6 = scmp.ne.s32.totalorder %s367_s27, %s548_s28  ;;  %p554_p8 = scmp.lt.s32.totalorder %s548_s28, %s548_s28 }
 0x4b3   :  { %p555_p9 = por %p554_p8, %p553_p7 }
 0x4b5   :  { %p556_p10 = pnand %p555_p9, %p549_p6 }
 0x534   :  { %v353_v49 = vpop.xlane.xlu1 %352 }
 0x535   :  { %466 = vlog2.f32 %v353_v49 }
 0x542   :  { %v467_v50 = vpop.eup %466 }
 0x543   :  { %v355_v51 = vmul.f32 0.6931472, %v467_v50 }
 0x545   :  { %v356_v52 = vsub.f32 %v349_v46, %v355_v51 }
 0x547   :  { %357 = vst [vmem:[#allocation8] sm:$0xff] %v356_v52 }
 0x548   :  { %559 = shalt.err (!%p556_p10)
}
 0x549   :  { %369 = dma.vmem_to_hbm [thread:$0]  %s367_s27, 128, %s682_s6, [#allocation4]  }
 0x54a   :  { %572 = dma.done.wait [#allocation4], 128  }
 0x54b   :  { %573 = vsyncadd [#allocation4], 4294967168 }
 0x54c   :  { %574 = dma.done.wait [#allocation10], 128  }
 0x54d   :  { %575 = vsyncadd [#allocation10], 4294967168 }
 0x54e   :  { %386 = vsyncpa [#allocation3], 1 }
 0x54f   :  { %387 = vsyncpa [#allocation6], 1 }
 0x550   :  { %388 = vsyncpa [#allocation4], 1 }
 0x551   :  { %389 = vsyncpa [#allocation10], 1 }

</bundles_post_ra>
